<compile_context>
chip_gen: v7x
topology: tpu7x:2x2x1
jax: 0.10.0
libtpu: 0.0.40
codegen_flags: <defaults>
</compile_context>

<pallas_src>
import functools

import jax
import jax.numpy as jnp
from jax.experimental import pallas as pl
from jax.experimental.pallas import tpu as pltpu


def _round_up(x, m):
    return ((x + m - 1) // m) * m


def _tcn_fused_kernel(halo_ref, cur_ref, w_ref, b_ref, o_ref, *,
                      K, dilations, h_pad):
    """Fused causal dilated conv stack for one (batch, time-tile) grid step.

    halo_ref : (1, h_pad, C)   last h_pad rows of the previous time tile (bf16)
    cur_ref  : (1, TL,    C)   current time tile of the level-0 input  (bf16)
    w_ref    : (Lv, K, C, C)   per-level weights, tap-major              (bf16)
    b_ref    : (Lv, 1, C)      per-level bias                            (f32)
    o_ref    : (1, TL, C)      final-level activation for this tile      (f32)
    """
    TL = cur_ref.shape[1]
    C = cur_ref.shape[2]
    W = h_pad + TL
    mxu_dtype = w_ref.dtype

    # Window = [halo | current tile] along time.  On the first time tile the
    # halo rows correspond to t < 0 and must be zero (causal zero padding).
    # The same mask is re-applied to every intermediate activation because in
    # the reference each conv zero-pads *its own* input.
    is_first = pl.program_id(1) == 0
    row = jax.lax.broadcasted_iota(jnp.int32, (W, 1), 0)
    hist_mask = jnp.broadcast_to(
        jnp.logical_and(is_first, row < h_pad), (W, C))       # hoisted once

    # Carry the activation window in f32 (mature sublane layout for the small
    # shifts below); cast to bf16 only at the MXU inputs.
    a = jnp.concatenate(
        [halo_ref[0, :, :].astype(jnp.float32),
         cur_ref[0, :, :].astype(jnp.float32)], axis=0)        # (W, C)
    a = jnp.where(hist_mask, jnp.zeros_like(a), a)

    num_levels = len(dilations)
    for i, d in enumerate(dilations):
        acc = jnp.zeros((W, C), jnp.float32)
        for k in range(K):
            s = (K - 1 - k) * d      # tap k reads the input shifted back by s
            if s == 0:
                xs = a
            else:
                xs = jnp.concatenate(
                    [jnp.zeros((s, C), jnp.float32), a[: W - s, :]], axis=0)
            acc = acc + jnp.dot(xs.astype(mxu_dtype), w_ref[i, k, :, :],
                                preferred_element_type=jnp.float32)
        acc = acc + b_ref[i, :, :]                       # (1, C) broadcast, f32
        act = jnp.where(acc >= 0, acc, 0.01 * acc)       # leaky_relu (f32 VPU)
        if i + 1 < num_levels:
            a = jnp.where(hist_mask, jnp.zeros_like(act), act)
        else:
            o_ref[0, :, :] = act[h_pad:, :].astype(o_ref.dtype)


def pack_params(params, *, kernel_size, compute_dtype=jnp.bfloat16):
    """Transpose/cast/pad all level weights once (hoisted out of the forward).

    Returns:
      w_all: (num_levels, K, C_pad, C_pad)  bf16, zero padded to 128 lanes
      b_all: (num_levels, 1, C_pad)         f32
    Zero padding keeps the padded channels identically zero through every
    level (0-weight in, 0-bias, leaky_relu(0) == 0).
    """
    num_levels = len(params)
    K = kernel_size
    c_max = max([params[0][0].shape[1]] + [w.shape[0] for w, _ in params])
    C_pad = _round_up(c_max, 128)
    w_all = jnp.zeros((num_levels, K, C_pad, C_pad), compute_dtype)
    b_all = jnp.zeros((num_levels, 1, C_pad), jnp.float32)
    for i, (w, b) in enumerate(params):
        c_out, c_in, k = w.shape
        assert k == K
        w_kic = jnp.transpose(w, (2, 1, 0)).astype(compute_dtype)  # (K,Cin,Cout)
        w_all = w_all.at[i, :, :c_in, :c_out].set(w_kic)
        b_all = b_all.at[i, 0, :c_out].set(b.astype(jnp.float32))
    return w_all, b_all


@functools.partial(jax.jit,
                   static_argnames=("kernel_size", "out_channels", "time_tile"))
def temporal_conv_net(x_ncl, w_all, b_all, *, kernel_size, out_channels,
                      time_tile=512):
    """Full TemporalConvNet forward.  x_ncl: (N, C_in, L), PyTorch NCL layout."""
    N, C_in, L = x_ncl.shape
    num_levels, K, C_pad, _ = w_all.shape
    assert K == kernel_size
    dilations = tuple(2 ** i for i in range(num_levels))
    compute_dtype = w_all.dtype

    # Receptive-field halo carried between time tiles, rounded up so it is a
    # multiple of 8 and divides the time tile (=> plain Blocked halo spec).
    h_total = sum((K - 1) * d for d in dilations)
    h_pad = max(8, pl.next_power_of_2(max(h_total, 1)))
    TL = min(time_tile, _round_up(L, 8))
    TL = _round_up(max(TL, h_pad), h_pad)
    L_pad = _round_up(L, TL)
    T = L_pad // TL
    m = TL // h_pad                       # halo blocks per time tile

    # NCL -> NLC once; pad time (tail) + channels (lane-dense 128) once.
    x = jnp.transpose(x_ncl, (0, 2, 1)).astype(compute_dtype)
    x = jnp.pad(x, ((0, 0), (0, L_pad - L), (0, C_pad - C_in)))

    kernel = functools.partial(_tcn_fused_kernel,
                               K=K, dilations=dilations, h_pad=h_pad)

    out = pl.pallas_call(
        kernel,
        out_shape=jax.ShapeDtypeStruct((N, L_pad, C_pad), jnp.float32),
        grid=(N, T),
        in_specs=[
            # Halo: last h_pad rows of the previous tile (clamped at t == 0,
            # where the kernel masks it to zero anyway).
            pl.BlockSpec((1, h_pad, C_pad),
                         lambda b, t: (b, jnp.maximum(t * m - 1, 0), 0)),
            # Current time tile.
            pl.BlockSpec((1, TL, C_pad), lambda b, t: (b, t, 0)),
            # Weights / bias: small, constant index map -> stay VMEM resident.
            pl.BlockSpec((num_levels, K, C_pad, C_pad),
                         lambda b, t: (0, 0, 0, 0)),
            pl.BlockSpec((num_levels, 1, C_pad), lambda b, t: (0, 0, 0)),
        ],
        out_specs=pl.BlockSpec((1, TL, C_pad), lambda b, t: (b, t, 0)),
        compiler_params=pltpu.CompilerParams(
            dimension_semantics=("parallel", "parallel"),
            vmem_limit_bytes=32 * 1024 * 1024,   # tiles sized well under v7x 64 MiB
        ),
    )(x, x, w_all, b_all)

    out = out[:, :L, :out_channels]          # strip time / channel padding
    return jnp.transpose(out, (0, 2, 1))     # back to NCL


def _reference(x_ncl, params, *, kernel_size, compute_dtype=jnp.float32):
    """Pure-JAX reference matching PyTorch Conv1d + Chomp1d + leaky_relu.

    compute_dtype controls matmul-input precision (f32 accumulation) so the
    bf16 kernel can be checked tightly."""
    K = kernel_size
    x = jnp.transpose(x_ncl, (0, 2, 1)).astype(jnp.float32)   # NLC
    for i, (w, b) in enumerate(params):
        d = 2 ** i
        pad = (K - 1) * d
        N, L, _ = x.shape
        xp = jnp.pad(x.astype(compute_dtype), ((0, 0), (pad, 0), (0, 0)))
        w_kic = jnp.transpose(w, (2, 1, 0)).astype(compute_dtype)  # (K,Cin,Cout)
        acc = jnp.zeros((N, L, w.shape[0]), jnp.float32)
        for k in range(K):
            xs = xp[:, k * d:k * d + L, :]
            acc = acc + jax.lax.dot_general(
                xs, w_kic[k], dimension_numbers=(((2,), (0,)), ((), ())),
                preferred_element_type=jnp.float32)
        acc = acc + b.astype(jnp.float32)[None, None, :]   # bias (Chomp applied)
        x = jnp.where(acc >= 0, acc, 0.01 * acc)            # leaky_relu
    return jnp.transpose(x, (0, 2, 1))


def init_params(key, num_inputs, num_channels, kernel_size):
    """Deterministic parameter init (weights ~ N(0, 0.01) as in init_weights)."""
    params = []
    c_in = num_inputs
    for c_out in num_channels:
        key, kw, kb = jax.random.split(key, 3)
        w = 0.01 * jax.random.normal(kw, (c_out, c_in, kernel_size), jnp.float32)
        b = 0.01 * jax.random.normal(kb, (c_out,), jnp.float32)
        params.append((w, b))
        c_in = c_out
    return params


if __name__ == "__main__":
    batch = 2
    num_inputs = 4
    seq_len = 16
    num_channels = [8, 16]   # two temporal blocks, dilations 1 and 2
    kernel_size = 2

    key = jax.random.PRNGKey(0)
    key, kx = jax.random.split(key)
    x = jax.random.normal(kx, (batch, num_inputs, seq_len), jnp.float32)  # NCL

    params = init_params(key, num_inputs, num_channels, kernel_size)
    w_all, b_all = pack_params(params, kernel_size=kernel_size)  # hoisted, once

    out = temporal_conv_net(x, w_all, b_all, kernel_size=kernel_size,
                            out_channels=num_channels[-1])
    out = jax.block_until_ready(out)
    assert out.shape == (batch, num_channels[-1], seq_len), out.shape

    # Tight check vs a reference using the same bf16 matmul inputs / f32 accum.
    ref_bf16 = _reference(x, params, kernel_size=kernel_size,
                          compute_dtype=jnp.bfloat16)
    assert jnp.allclose(out, ref_bf16, atol=5e-4, rtol=5e-2), (
        "bf16-matched mismatch, max abs diff = %g"
        % float(jnp.max(jnp.abs(out - ref_bf16))))

    # Looser sanity check vs the exact f32 PyTorch-semantics reference.
    ref_f32 = _reference(x, params, kernel_size=kernel_size)
    assert jnp.allclose(out, ref_f32, atol=1e-2, rtol=1e-1), (
        "f32 reference mismatch, max abs diff = %g"
        % float(jnp.max(jnp.abs(out - ref_f32))))

    print("KERNEL_OK")
</pallas_src>

<mosaic_0001>
module attributes {stable_mosaic.version = 11 : i64} {
  func.func @_tcn_fused_kernel(%arg0: i32, %arg1: i32, %arg2: memref<1x8x128xbf16, #tpu.memory_space<vmem>>, %arg3: memref<1x16x128xbf16, #tpu.memory_space<vmem>>, %arg4: memref<2x2x128x128xbf16, #tpu.memory_space<vmem>>, %arg5: memref<2x1x128xf32, #tpu.memory_space<vmem>>, %arg6: memref<1x16x128xf32, #tpu.memory_space<vmem>>) attributes {dimension_semantics = [#tpu.dimension_semantics<parallel>, #tpu.dimension_semantics<parallel>], iteration_bounds = array<i64: 2, 1>, scalar_prefetch = 0 : i64, scratch_operands = 0 : i64, tpu.core_type = #tpu.core_type<tc>, window_params = [{transform_indices = @transform_0, window_bounds = array<i64: 1, 8, 128>}, {transform_indices = @transform_1, window_bounds = array<i64: 1, 16, 128>}, {pipeline_mode = #tpu.pipeline_mode<synchronous>, transform_indices = @transform_2, window_bounds = array<i64: 2, 2, 128, 128>}, {pipeline_mode = #tpu.pipeline_mode<synchronous>, transform_indices = @transform_3, window_bounds = array<i64: 2, 1, 128>}, {transform_indices = @transform_4, window_bounds = array<i64: 1, 16, 128>}]} {
    %c0_i32 = arith.constant 0 : i32
    %0 = arith.cmpi eq, %arg1, %c0_i32 : i32
    %1 = tpu.iota {dimensions = array<i32: 0>} : vector<24x1xi32>
    %c8_i32 = arith.constant 8 : i32
    %2 = vector.broadcast %c8_i32 : i32 to vector<24x1xi32>
    %3 = arith.cmpi slt, %1, %2 : vector<24x1xi32>
    %4 = vector.broadcast %0 : i1 to vector<24x1xi1>
    %5 = arith.andi %4, %3 : vector<24x1xi1>
    %6 = vector.shape_cast %5 : vector<24x1xi1> to vector<24x1xi1>
    %7 = vector.broadcast %6 : vector<24x1xi1> to vector<24x128xi1>
    %c0 = arith.constant 0 : index
    %c0_0 = arith.constant 0 : index
    %c0_1 = arith.constant 0 : index
    %8 = vector.load %arg2[%c0, %c0_0, %c0_1] : memref<1x8x128xbf16, #tpu.memory_space<vmem>>, vector<1x8x128xbf16>
    %9 = vector.shape_cast %8 : vector<1x8x128xbf16> to vector<8x128xbf16>
    %10 = arith.extf %9 : vector<8x128xbf16> to vector<8x128xf32>
    %c0_2 = arith.constant 0 : index
    %c0_3 = arith.constant 0 : index
    %c0_4 = arith.constant 0 : index
    %11 = vector.load %arg3[%c0_2, %c0_3, %c0_4] : memref<1x16x128xbf16, #tpu.memory_space<vmem>>, vector<1x16x128xbf16>
    %12 = vector.shape_cast %11 : vector<1x16x128xbf16> to vector<16x128xbf16>
    %13 = arith.extf %12 : vector<16x128xbf16> to vector<16x128xf32>
    %14 = tpu.concatenate %10, %13 in 0 : vector<8x128xf32>, vector<16x128xf32> -> vector<24x128xf32>
    %cst = arith.constant 0.000000e+00 : f32
    %15 = vector.broadcast %cst : f32 to vector<24x128xf32>
    %16 = arith.select %7, %15, %14 : vector<24x128xi1>, vector<24x128xf32>
    %cst_5 = arith.constant 0.000000e+00 : f32
    %17 = vector.broadcast %cst_5 : f32 to vector<24x128xf32>
    %cst_6 = arith.constant 0.000000e+00 : f32
    %18 = vector.broadcast %cst_6 : f32 to vector<1x128xf32>
    %19 = vector.extract_strided_slice %16 {offsets = [0, 0], sizes = [23, 128], strides = [1, 1]} : vector<24x128xf32> to vector<23x128xf32>
    %20 = tpu.concatenate %18, %19 in 0 : vector<1x128xf32>, vector<23x128xf32> -> vector<24x128xf32>
    %21 = arith.truncf %20 : vector<24x128xf32> to vector<24x128xbf16>
    %c0_7 = arith.constant 0 : index
    %c0_8 = arith.constant 0 : index
    %c0_9 = arith.constant 0 : index
    %c0_10 = arith.constant 0 : index
    %22 = vector.load %arg4[%c0_7, %c0_8, %c0_9, %c0_10] : memref<2x2x128x128xbf16, #tpu.memory_space<vmem>>, vector<1x1x128x128xbf16>
    %23 = vector.shape_cast %22 : vector<1x1x128x128xbf16> to vector<128x128xbf16>
    %cst_11 = arith.constant dense<0.000000e+00> : vector<24x128xf32>
    %24 = tpu.matmul %21, %23, %cst_11 {dimension_numbers = #tpu.dot_dimension_numbers<[1], [0], [0], [1], [0, 0, 1, 1], [], []>} : vector<24x128xbf16>, vector<128x128xbf16>, vector<24x128xf32> -> vector<24x128xf32>
    %25 = arith.addf %17, %24 : vector<24x128xf32>
    %26 = arith.truncf %16 : vector<24x128xf32> to vector<24x128xbf16>
    %c0_12 = arith.constant 0 : index
    %c1 = arith.constant 1 : index
    %c0_13 = arith.constant 0 : index
    %c0_14 = arith.constant 0 : index
    %27 = vector.load %arg4[%c0_12, %c1, %c0_13, %c0_14] : memref<2x2x128x128xbf16, #tpu.memory_space<vmem>>, vector<1x1x128x128xbf16>
    %28 = vector.shape_cast %27 : vector<1x1x128x128xbf16> to vector<128x128xbf16>
    %cst_15 = arith.constant dense<0.000000e+00> : vector<24x128xf32>
    %29 = tpu.matmul %26, %28, %cst_15 {dimension_numbers = #tpu.dot_dimension_numbers<[1], [0], [0], [1], [0, 0, 1, 1], [], []>} : vector<24x128xbf16>, vector<128x128xbf16>, vector<24x128xf32> -> vector<24x128xf32>
    %30 = arith.addf %25, %29 : vector<24x128xf32>
    %c0_16 = arith.constant 0 : index
    %c0_17 = arith.constant 0 : index
    %c0_18 = arith.constant 0 : index
    %31 = vector.load %arg5[%c0_16, %c0_17, %c0_18] : memref<2x1x128xf32, #tpu.memory_space<vmem>>, vector<1x1x128xf32>
    %32 = vector.shape_cast %31 : vector<1x1x128xf32> to vector<1x128xf32>
    %33 = vector.broadcast %32 : vector<1x128xf32> to vector<24x128xf32>
    %34 = arith.addf %30, %33 : vector<24x128xf32>
    %cst_19 = arith.constant 0.000000e+00 : f32
    %35 = vector.broadcast %cst_19 : f32 to vector<24x128xf32>
    %36 = arith.cmpf oge, %34, %35 : vector<24x128xf32>
    %cst_20 = arith.constant 0.00999999977 : f32
    %37 = vector.broadcast %cst_20 : f32 to vector<24x128xf32>
    %38 = arith.mulf %37, %34 : vector<24x128xf32>
    %39 = arith.select %36, %34, %38 : vector<24x128xi1>, vector<24x128xf32>
    %cst_21 = arith.constant 0.000000e+00 : f32
    %40 = vector.broadcast %cst_21 : f32 to vector<24x128xf32>
    %41 = arith.select %7, %40, %39 : vector<24x128xi1>, vector<24x128xf32>
    %cst_22 = arith.constant 0.000000e+00 : f32
    %42 = vector.broadcast %cst_22 : f32 to vector<24x128xf32>
    %cst_23 = arith.constant 0.000000e+00 : f32
    %43 = vector.broadcast %cst_23 : f32 to vector<2x128xf32>
    %44 = vector.extract_strided_slice %41 {offsets = [0, 0], sizes = [22, 128], strides = [1, 1]} : vector<24x128xf32> to vector<22x128xf32>
    %45 = tpu.concatenate %43, %44 in 0 : vector<2x128xf32>, vector<22x128xf32> -> vector<24x128xf32>
    %46 = arith.truncf %45 : vector<24x128xf32> to vector<24x128xbf16>
    %c1_24 = arith.constant 1 : index
    %c0_25 = arith.constant 0 : index
    %c0_26 = arith.constant 0 : index
    %c0_27 = arith.constant 0 : index
    %47 = vector.load %arg4[%c1_24, %c0_25, %c0_26, %c0_27] : memref<2x2x128x128xbf16, #tpu.memory_space<vmem>>, vector<1x1x128x128xbf16>
    %48 = vector.shape_cast %47 : vector<1x1x128x128xbf16> to vector<128x128xbf16>
    %cst_28 = arith.constant dense<0.000000e+00> : vector<24x128xf32>
    %49 = tpu.matmul %46, %48, %cst_28 {dimension_numbers = #tpu.dot_dimension_numbers<[1], [0], [0], [1], [0, 0, 1, 1], [], []>} : vector<24x128xbf16>, vector<128x128xbf16>, vector<24x128xf32> -> vector<24x128xf32>
    %50 = arith.addf %42, %49 : vector<24x128xf32>
    %51 = arith.truncf %41 : vector<24x128xf32> to vector<24x128xbf16>
    %c1_29 = arith.constant 1 : index
    %c1_30 = arith.constant 1 : index
    %c0_31 = arith.constant 0 : index
    %c0_32 = arith.constant 0 : index
    %52 = vector.load %arg4[%c1_29, %c1_30, %c0_31, %c0_32] : memref<2x2x128x128xbf16, #tpu.memory_space<vmem>>, vector<1x1x128x128xbf16>
    %53 = vector.shape_cast %52 : vector<1x1x128x128xbf16> to vector<128x128xbf16>
    %cst_33 = arith.constant dense<0.000000e+00> : vector<24x128xf32>
    %54 = tpu.matmul %51, %53, %cst_33 {dimension_numbers = #tpu.dot_dimension_numbers<[1], [0], [0], [1], [0, 0, 1, 1], [], []>} : vector<24x128xbf16>, vector<128x128xbf16>, vector<24x128xf32> -> vector<24x128xf32>
    %55 = arith.addf %50, %54 : vector<24x128xf32>
    %c1_34 = arith.constant 1 : index
    %c0_35 = arith.constant 0 : index
    %c0_36 = arith.constant 0 : index
    %56 = vector.load %arg5[%c1_34, %c0_35, %c0_36] : memref<2x1x128xf32, #tpu.memory_space<vmem>>, vector<1x1x128xf32>
    %57 = vector.shape_cast %56 : vector<1x1x128xf32> to vector<1x128xf32>
    %58 = vector.broadcast %57 : vector<1x128xf32> to vector<24x128xf32>
    %59 = arith.addf %55, %58 : vector<24x128xf32>
    %cst_37 = arith.constant 0.000000e+00 : f32
    %60 = vector.broadcast %cst_37 : f32 to vector<24x128xf32>
    %61 = arith.cmpf oge, %59, %60 : vector<24x128xf32>
    %cst_38 = arith.constant 0.00999999977 : f32
    %62 = vector.broadcast %cst_38 : f32 to vector<24x128xf32>
    %63 = arith.mulf %62, %59 : vector<24x128xf32>
    %64 = arith.select %61, %59, %63 : vector<24x128xi1>, vector<24x128xf32>
    %65 = vector.extract_strided_slice %64 {offsets = [8, 0], sizes = [16, 128], strides = [1, 1]} : vector<24x128xf32> to vector<16x128xf32>
    %c0_39 = arith.constant 0 : index
    %c0_40 = arith.constant 0 : index
    %c0_41 = arith.constant 0 : index
    %66 = vector.load %arg6[%c0_39, %c0_40, %c0_41] : memref<1x16x128xf32, #tpu.memory_space<vmem>>, vector<1x16x128xf32>
    %67 = vector.shape_cast %66 : vector<1x16x128xf32> to vector<16x128xf32>
    %68 = vector.shape_cast %65 : vector<16x128xf32> to vector<1x16x128xf32>
    tpu.vector_store %arg6[%c0_39, %c0_40, %c0_41], %68 {strides = array<i32>} : memref<1x16x128xf32, #tpu.memory_space<vmem>>, vector<1x16x128xf32>,
    return
  }
  func.func @transform_0(%arg0: i32, %arg1: i32) -> (i32, i32, i32) {
    %c2_i32 = arith.constant 2 : i32
    %0 = arith.muli %arg1, %c2_i32 : i32
    %c1_i32 = arith.constant 1 : i32
    %1 = arith.subi %0, %c1_i32 : i32
    %c0_i32 = arith.constant 0 : i32
    %2 = arith.maxsi %1, %c0_i32 : i32
    %c0_i32_0 = arith.constant 0 : i32
    %c0_i32_1 = arith.constant 0 : i32
    return %arg0, %2, %c0_i32_0 : i32, i32, i32
  }
  func.func @transform_1(%arg0: i32, %arg1: i32) -> (i32, i32, i32) {
    %c0_i32 = arith.constant 0 : i32
    %c0_i32_0 = arith.constant 0 : i32
    return %arg0, %arg1, %c0_i32 : i32, i32, i32
  }
  func.func @transform_2(%arg0: i32, %arg1: i32) -> (i32, i32, i32, i32) {
    %c0_i32 = arith.constant 0 : i32
    %c0_i32_0 = arith.constant 0 : i32
    %c0_i32_1 = arith.constant 0 : i32
    %c0_i32_2 = arith.constant 0 : i32
    %c0_i32_3 = arith.constant 0 : i32
    return %c0_i32, %c0_i32_0, %c0_i32_1, %c0_i32_2 : i32, i32, i32, i32
  }
  func.func @transform_3(%arg0: i32, %arg1: i32) -> (i32, i32, i32) {
    %c0_i32 = arith.constant 0 : i32
    %c0_i32_0 = arith.constant 0 : i32
    %c0_i32_1 = arith.constant 0 : i32
    %c0_i32_2 = arith.constant 0 : i32
    return %c0_i32, %c0_i32_0, %c0_i32_1 : i32, i32, i32
  }
  func.func @transform_4(%arg0: i32, %arg1: i32) -> (i32, i32, i32) {
    %c0_i32 = arith.constant 0 : i32
    %c0_i32_0 = arith.constant 0 : i32
    return %arg0, %arg1, %c0_i32 : i32, i32, i32
  }
}

</mosaic_0001>

<bundles_post_ra>
// kernel: temporal_conv_net.1
= control target key start
LH: loop header
LB: loop body
LE: loop exit
PB: predicated region body
PF: predicated region fallthrough
CT: control target
= control target key end

     0   :  { %9 = vsyncpa [#allocation3], 0  ;;  %s1321_s15 = smov 0   ;;  %s1323_s16 = smov 0   ;;  %s1416_s0 = inlined_call_operand.vmem [shape: bf16[2,16,128], index: 0, kind: input, shape index: {}, may-alias: {0,1}]   ;;  %s1417_s1 = inlined_call_operand.vmem [shape: bf16[2,16,128], index: 1, kind: input, shape index: {}, may-alias: {0,1}]   ;;  %s1418_s2 = inlined_call_operand.hbm [shape: bf16[2,2,128,128], index: 2, kind: input, shape index: {}]   ;;  %s1419_s3 = inlined_call_operand.vmem [shape: f32[2,1,128], index: 3, kind: input, shape index: {}]   ;;  %s1420_s4 = inlined_call_operand.vmem [shape: f32[2,16,128], index: 4, kind: output, shape index: {}]  }
   0x1   :  { %s1325_s17 = smov 0  }
   0x2 LB: > { %s981_s0 = sadd.s32 4294967295, %s1289_s17   ;;  %s27_s18 = sadd.s32 1, %s1285_s16  ;;  %s1289_s17 = sphi %s1325_s17, %s15_s17   ;;  %s1285_s16 = sphi %s1323_s16, %s1430_s16   ;;  %s1281_s15 = sphi %s1321_s15, %s1429_s15  }
   0x3   : > { %p29_p0 = scmp.ge.s32.totalorder %s27_s18, 2  ;;  %p983_p1 = scmp.ge.s32.totalorder %s1289_s17, 1 }
   0x4   : > { %p166_p2 = scmp.lt.s32.totalorder %s1289_s17, 3  ;;  %p1346_p4 = scmp.eq.s32.totalorder %s981_s0, 0 }
   0x5   : > { %s1432_s18 = smov (%p29_p0, %s27_s18), 0  ;;  %s1291_s21 = smov [#allocation2]  }
   0x6   : > { %p1342_p3 = pnand %p983_p1, %p166_p2  ;;  %s178_s22 = sshll.u32 %s1291_s21, 4  ;;  %s179_s22 = int_to_ptr.vmem [resolvable:$true] %s178_s22 }
   0x7   : > { %s1425_s20 = scalar_select %p1346_p4, 1, 0 }
   0x8   : > { %s1424_s19 = scalar_select %p1342_p3, 1, 0 }
   0x9   : > { %p1167_p5 = pneg %p1342_p3  ;;  %s1235_s26 = scalar_lea.hbm %s1418_s2, 4096 }
   0xa   : > { %p1236_p7 = scmp.ne.s32.totalorder %s1418_s2, %s1235_s26  ;;  %p1242_p11 = scmp.lt.u32.totalorder %s1235_s26, %s1418_s2 }
   0xb   : > { %p1354_p6 = pnand %p1346_p4, %p1167_p5 }
   0xd   : > { %p1237_p8 = pneg %p1354_p6 }
   0xf   : > { %p1238_p9 = pnand %p1237_p8, %p1236_p7 }
  0x11   : > { %p1239_p10 = pneg %p1238_p9 }
  0x13   : > { %p1244_p12 = pnand %p1242_p11, %p1239_p10 }
  0x15   : > { %1247 = shalt.err (!%p1244_p12)
}
  0x16   : > { %s1248_s5 = scalar_lea.vmem %s179_s22, 4096  ;;  %p1256_p2 = scmp.lt.s32.totalorder %s179_s22, %s179_s22 }
  0x17   : > { %p1249_p13 = scmp.ne.s32.totalorder %s179_s22, %s1248_s5  ;;  %p1257_p5 = scmp.lt.s32.totalorder %s1248_s5, %s1248_s5 }
  0x19   : > { %p1251_p0 = pnand %p1249_p13, %p1237_p8  ;;  %p1258_p4 = por %p1257_p5, %p1256_p2 }
  0x1b   : > { %p1252_p1 = pneg %p1251_p0 }
  0x1d   : > { %p1259_p3 = pnand %p1258_p4, %p1252_p1 }
  0x1f   : > { %1262 = shalt.err (!%p1259_p3)
}
  0x20   : > { %s1292_s6 = smov 64   ;;  %s1293_s7 = smov 4  }
  0x21   : > { %1170 = dma.hbm_to_vmem [thread:$0]  (!%p1354_p6), %s1418_s2, 4096, %s179_s22, [#allocation3], %s1292_s6, %s1292_s6, %s1293_s7  }
  0x22   : > { %p1427_p7 = scmp.ne.s32.totalorder %s1424_s19, 0 }
  0x23   : > { %p1428_p9 = scmp.ne.s32.totalorder (!%p1427_p7), %s1425_s20, 0 }
  0x24   : > { %229 = sbr.rel (%p1427_p7) target bundleno = 529 (0x211), region = 36 }
  0x2b   : > { %1276 = dma.done.wait (%p1428_p9), [#allocation3], 4096  }
  0x2c   : > { %1278 = vsyncadd (%p1428_p9), [#allocation3], 4294963200  ;;  %v1202_v0 = vld [vmem:[#allocation2 + $0x40] sm:$0xff]   ;;  %v1204_v2 = vld [vmem:[#allocation2 + $0x48] sm:$0xff]   ;;  %p292_p3 = scmp.lt.s32.totalorder %s1281_s15, 1  ;;  %vm344_vm0 = vcmask 1040384  }
  0x2d   : > { %v1203_v1 = vld [vmem:[#allocation2] sm:$0xff]   ;;  %1083 = vmatprep.subr.bf16.mxu0 %v1202_v0  ;;  %v1205_v3 = vld [vmem:[#allocation2 + $0x8] sm:$0xff]   ;;  %v1206_v4 = vld [vmem:[#allocation2 + $0x50] sm:$0xff]   ;;  %v1294_v13 = vmov 0.0   ;;  %vm1295_vm2 = vmmov 1   ;;  %vm608_vm5 = vcmask 1041408  }
  0x2e   : > { %1103 = vmatprep.subr.bf16.mxu1 %v1203_v1  ;;  %1084 = vmatpush3.bf16.msra.mxu0 %v1202_v0  ;;  %v1207_v5 = vld [vmem:[#allocation2 + $0x10] sm:$0xff]   ;;  %s1434_s15 = smov (!%p292_p3, %s1281_s15), 1  ;;  %v1208_v6 = vld [vmem:[#allocation2 + $0x58] sm:$0xff]   ;;  %v1210_v8 = vld [vmem:[#allocation2 + $0x60] sm:$0xff]   ;;  %v345_v14 = vrot.slane %v1294_v13, 7  ;;  %v609_v62 = vrot.slane %v1294_v13, 6 }
  0x2f   : > { %1104 = vmatpush3.bf16.msra.mxu1 %v1203_v1  ;;  %1085 = vmatprep.subr.bf16.mxu0 %v1204_v2  ;;  %v1209_v7 = vld [vmem:[#allocation2 + $0x18] sm:$0xff]   ;;  %s1041_s10 = sshll.u32 %s1434_s15, 3  ;;  %v1211_v9 = vld [vmem:[#allocation2 + $0x20] sm:$0xff]   ;;  %v1212_v10 = vld [vmem:[#allocation2 + $0x68] sm:$0xff]   ;;  %s1042_s21 = sshll.u32 %s1434_s15, 4 }
  0x30   : > { %1105 = vmatprep.subr.bf16.mxu1 %v1205_v3  ;;  %s299_s13 = scalar_lea.vmem %s1417_s1, %s1041_s10  ;;  %v1213_v11 = vld [vmem:[#allocation2 + $0x28] sm:$0xff]   ;;  %v1214_v17 = vld [vmem:[#allocation2 + $0x70] sm:$0xff]   ;;  %vm1011_vm1 = vmneg %vm344_vm0  ;;  %s309_s24 = scalar_lea.vmem %s1420_s4, %s1042_s21 }
  0x31   : > { %v334_v12 = vld [vmem:[%s299_s13] sm:$0xf]  ;;  %v335_v15 = vld [vmem:[%s299_s13 + $0x4] sm:$0xf]  ;;  %v1215_v21 = vld [vmem:[#allocation2 + $0x30] sm:$0xff]  }
  0x32   : > { %1086 = vmatpush3.bf16.msra.mxu0 %v1204_v2  ;;  %v336_v16 = vunpack.c.l.bf16 %v334_v12  ;;  %v337_v20 = vunpack.c.l.bf16 %v335_v15  ;;  %vm1012_vm3 = vmpackc.low %vm1295_vm2, %vm1011_vm1  ;;  %v1216_v24 = vld [vmem:[#allocation2 + $0x78] sm:$0xff]   ;;  %v1219_v27 = vld [vmem:[#allocation2 + $0xc0] sm:$0xff]   ;;  %v994_v30 = vcombine.low %v335_v15, %v335_v15 }
  0x33   : > { %1106 = vmatpush3.bf16.msra.mxu1 %v1205_v3  ;;  %1087 = vmatprep.subr.bf16.mxu0 %v1206_v4  ;;  %v1217_v26 = vld [vmem:[#allocation2 + $0x38] sm:$0xff]   ;;  %v1220_v28 = vld [vmem:[#allocation2 + $0x80] sm:$0xff]   ;;  %v1221_v32 = vld [vmem:[#allocation2 + $0xc8] sm:$0xff]  }
  0x34   : > { %1107 = vmatprep.subr.bf16.mxu1 %v1207_v5  ;;  %v346_v18 = vrot.slane %v336_v16, 7  ;;  %v372_v19 = vpack.c.bf16 %v336_v16, %v1294_v13  ;;  %v348_v25 = vrot.slane %v337_v20, 7  ;;  %v1222_v33 = vld [vmem:[#allocation2 + $0x88] sm:$0xff]   ;;  %v1223_v34 = vld [vmem:[#allocation2 + $0xd0] sm:$0xff]   ;;  %v1225_v36 = vld [vmem:[#allocation2 + $0xd8] sm:$0xff]  }
  0x35   : > { %v1224_v35 = vld [vmem:[#allocation2 + $0x90] sm:$0xff]   ;;  %v1226_v37 = vld [vmem:[#allocation2 + $0x98] sm:$0xff]   ;;  %v1227_v38 = vld [vmem:[#allocation2 + $0xe0] sm:$0xff]  }
  0x36   : > { %1088 = vmatpush3.bf16.msra.mxu0 %v1206_v4  ;;  %1099 = vmatprep.mubr.bf16.mxu0 %v372_v19  ;;  %v347_v22 = vsel %vm344_vm0, %v345_v14, %v346_v18  ;;  %v349_v29 = vsel %vm344_vm0, %v346_v18, %v348_v25  ;;  %v1228_v39 = vld [vmem:[#allocation2 + $0xa0] sm:$0xff]   ;;  %v1229_v40 = vld [vmem:[#allocation2 + $0xe8] sm:$0xff]   ;;  %v1231_v42 = vld [vmem:[#allocation2 + $0xf0] sm:$0xff]  }
  0x37   : > { %1108 = vmatpush3.bf16.msra.mxu1 %v1207_v5  ;;  %1089 = vmatprep.subr.bf16.mxu0 %v1208_v6  ;;  %v1013_v23 = vpack.c.bf16 %v347_v22, %v345_v14  ;;  %v355_v31 = vpack.c.bf16 %v349_v29, %v349_v29  ;;  %v1230_v41 = vld [vmem:[#allocation2 + $0xa8] sm:$0xff]   ;;  %v1232_v43 = vld [vmem:[#allocation2 + $0xb0] sm:$0xff]   ;;  %v1233_v44 = vld [vmem:[#allocation2 + $0xf8] sm:$0xff]  }
  0x38   : > { %1109 = vmatprep.subr.bf16.mxu1 %v1209_v7  ;;  %v1234_v45 = vld [vmem:[#allocation2 + $0xb8] sm:$0xff]   ;;  %v1015_v48 = vld [vmem:[%s1419_s3] ss:$0 sm:$0xff]  ;;  %vm1032_vm7 = vmneg %vm608_vm5 }
  0x39   : > { %1119 = vmatprep.mubr.msk.bf16.mxu1 %vm1012_vm3, %v1013_v23  ;;  %vm1033_vm8 = vmpackc.low %vm1295_vm2, %vm1032_vm7 }
  0x3a   : > { %1090 = vmatpush3.bf16.msra.mxu0 %v1208_v6 }
  0x3b   : > { %1110 = vmatpush3.bf16.msra.mxu1 %v1209_v7  ;;  %1091 = vmatprep.subr.bf16.mxu0 %v1210_v8 }
  0x3c   : > { %1111 = vmatprep.subr.bf16.mxu1 %v1211_v9 }
  0x3e   : > { %1092 = vmatpush3.bf16.msra.mxu0 %v1210_v8 }
  0x3f   : > { %1112 = vmatpush3.bf16.msra.mxu1 %v1211_v9  ;;  %1093 = vmatprep.subr.bf16.mxu0 %v1212_v10 }
  0x40   : > { %1113 = vmatprep.subr.bf16.mxu1 %v1213_v11 }
  0x42   : > { %1094 = vmatpush3.bf16.msra.mxu0 %v1212_v10 }
  0x43   : > { %1114 = vmatpush3.bf16.msra.mxu1 %v1213_v11  ;;  %1095 = vmatprep.subr.bf16.mxu0 %v1214_v17 }
  0x44   : > { %1115 = vmatprep.subr.bf16.mxu1 %v1215_v21 }
  0x46   : > { %1096 = vmatpush3.bf16.msra.mxu0 %v1214_v17 }
  0x47   : > { %1116 = vmatpush3.bf16.msra.mxu1 %v1215_v21  ;;  %1097 = vmatprep.subr.bf16.mxu0 %v1216_v24 }
  0x48   : > { %1117 = vmatprep.subr.bf16.mxu1 %v1217_v26 }
  0x4a   : > { %1098 = vmatpush3.bf16.msra.mxu0 %v1216_v24 }
  0x4b   : > { %1118 = vmatpush3.bf16.msra.mxu1 %v1217_v26  ;;  %1123 = vmatprep.subr.bf16.mxu0 %v1219_v27 }
  0x4c   : > { %1143 = vmatprep.subr.bf16.mxu1 %v1220_v28 }
  0x4d   : > { %1100 = vmatmul.mubr.bf16.vlgmr.msra.gmra.mrb[0].mxu0 %v994_v30 }
  0x4e   : > { %1120 = vmatmul.mubr.bf16.vlgmr.msra.gmra.mrb[0].mxu1 %v355_v31  ;;  %1124 = vmatpush3.bf16.msra.mxu0 %v1219_v27 }
  0x4f   : > { %1125 = vmatprep.subr.bf16.mxu0 %v1221_v32  ;;  %1144 = vmatpush3.bf16.msra.mxu1 %v1220_v28 }
  0x50   : > { %1145 = vmatprep.subr.bf16.mxu1 %v1222_v33 }
  0x52   : > { %1126 = vmatpush3.bf16.msra.mxu0 %v1221_v32 }
  0x53   : > { %1127 = vmatprep.subr.bf16.mxu0 %v1223_v34  ;;  %1146 = vmatpush3.bf16.msra.mxu1 %v1222_v33 }
  0x54   : > { %1147 = vmatprep.subr.bf16.mxu1 %v1224_v35 }
  0x56   : > { %1128 = vmatpush3.bf16.msra.mxu0 %v1223_v34 }
  0x57   : > { %1129 = vmatprep.subr.bf16.mxu0 %v1225_v36  ;;  %1148 = vmatpush3.bf16.msra.mxu1 %v1224_v35 }
  0x58   : > { %1149 = vmatprep.subr.bf16.mxu1 %v1226_v37 }
  0x5a   : > { %1130 = vmatpush3.bf16.msra.mxu0 %v1225_v36 }
  0x5b   : > { %1131 = vmatprep.subr.bf16.mxu0 %v1227_v38  ;;  %1150 = vmatpush3.bf16.msra.mxu1 %v1226_v37 }
  0x5c   : > { %1151 = vmatprep.subr.bf16.mxu1 %v1228_v39 }
  0x5e   : > { %1132 = vmatpush3.bf16.msra.mxu0 %v1227_v38 }
  0x5f   : > { %1133 = vmatprep.subr.bf16.mxu0 %v1229_v40  ;;  %1152 = vmatpush3.bf16.msra.mxu1 %v1228_v39 }
  0x60   : > { %1153 = vmatprep.subr.bf16.mxu1 %v1230_v41 }
  0x62   : > { %1134 = vmatpush3.bf16.msra.mxu0 %v1229_v40 }
  0x63   : > { %1135 = vmatprep.subr.bf16.mxu0 %v1231_v42  ;;  %1154 = vmatpush3.bf16.msra.mxu1 %v1230_v41 }
  0x64   : > { %1155 = vmatprep.subr.bf16.mxu1 %v1232_v43 }
  0x66   : > { %1136 = vmatpush3.bf16.msra.mxu0 %v1231_v42 }
  0x67   : > { %1137 = vmatprep.subr.bf16.mxu0 %v1233_v44  ;;  %1156 = vmatpush3.bf16.msra.mxu1 %v1232_v43 }
  0x68   : > { %1157 = vmatprep.subr.bf16.mxu1 %v1234_v45 }
  0x6a   : > { %1138 = vmatpush3.bf16.msra.mxu0 %v1233_v44 }
  0x6b   : > { %1158 = vmatpush3.bf16.msra.mxu1 %v1234_v45 }
 0x120   : > { %v1101_v46 = vpop.f32.mrb[0].mxu0 }
 0x121   : > { %v1121_v47 = vpop.f32.mrb[0].mxu1  ;;  %v473_v49 = vpop.f32.mrb[1].mxu0 }
 0x122   : > { %v578_v50 = vadd.f32 %v1121_v47, %v1101_v46  ;;  %v569_v51 = vpop.f32.mrb[1].mxu1  ;;  %v1102_v52 = vpop.f32.mrb[2].mxu0 }
 0x123   : > { %v1122_v53 = vpop.f32.mrb[2].mxu1  ;;  %v476_v54 = vpop.f32.mrb[3].mxu0 }
 0x124   : > { %v592_v55 = vadd.f32 %v1015_v48, %v578_v50  ;;  %v572_v56 = vpop.f32.mrb[3].mxu1 }
 0x125   : > { %v573_v57 = vadd.f32 %v572_v56, %v476_v54 }
 0x126   : > { %vm595_vm4 = vcmp.ge.f32.partialorder %v592_v55, 0.0  ;;  %v598_v58 = vmul.f32 0.01, %v592_v55 }
 0x127   : > { %v591_v59 = vadd.f32 %v1015_v48, %v573_v57 }
 0x128   : > { %v601_v60 = vsel %vm595_vm4, %v592_v55, %v598_v58 }
 0x129   : > { %vm594_vm6 = vcmp.ge.f32.partialorder %v591_v59, 0.0  ;;  %v597_v61 = vmul.f32 0.01, %v591_v59  ;;  %v612_v0 = vrot.slane %v601_v60, 6  ;;  %v638_v3 = vpack.c.bf16 %v601_v60, %v601_v60 }
 0x12b   : > { %v600_v63 = vsel %vm594_vm6, %v591_v59, %v597_v61 }
 0x12c   : > { %v610_v1 = vrot.slane %v600_v63, 6  ;;  %v637_v2 = vpack.c.bf16 %v600_v63, %v1294_v13  ;;  %v1037_v13 = vld [vmem:[%s1419_s3 + $0x1] ss:$0 sm:$0xff] }
 0x12e   : > { %1139 = vmatprep.mubr.bf16.mxu0 %v637_v2  ;;  %v611_v4 = vsel %vm608_vm5, %v609_v62, %v610_v1  ;;  %v613_v5 = vsel %vm608_vm5, %v610_v1, %v612_v0 }
 0x12f   : > { %1140 = vmatmul.mubr.bf16.vlgmr.msra.gmra.mrb[4].mxu0 %v638_v3  ;;  %v1034_v6 = vpack.c.bf16 %v611_v4, %v609_v62  ;;  %v619_v7 = vpack.c.bf16 %v613_v5, %v613_v5 }
 0x131   : > { %1159 = vmatprep.mubr.msk.bf16.mxu1 %vm1033_vm8, %v1034_v6 }
 0x132   : > { %1160 = vmatmul.mubr.bf16.vlgmr.msra.gmra.mrb[4].mxu1 %v619_v7 }
 0x202   : > { %v1141_v8 = vpop.f32.mrb[4].mxu0 }
 0x203   : > { %v738_v9 = vpop.f32.mrb[5].mxu0 }
 0x204   : > { %v1142_v10 = vpop.f32.mrb[6].mxu0 }
 0x205   : > { %v740_v11 = vpop.f32.mrb[7].mxu0  ;;  %v1161_v12 = vpop.f32.mrb[4].mxu1 }
 0x206   : > { %v841_v14 = vadd.f32 %v1161_v12, %v1141_v8  ;;  %v833_v15 = vpop.f32.mrb[5].mxu1 }
 0x207   : > { %v1162_v16 = vpop.f32.mrb[6].mxu1 }
 0x208   : > { %v855_v17 = vadd.f32 %v1037_v13, %v841_v14  ;;  %v835_v18 = vpop.f32.mrb[7].mxu1 }
 0x209   : > { %v836_v19 = vadd.f32 %v835_v18, %v740_v11 }
 0x20a   : > { %vm857_vm9 = vcmp.ge.f32.partialorder %v855_v17, 0.0  ;;  %v859_v20 = vmul.f32 0.01, %v855_v17 }
 0x20b   : > { %v854_v21 = vadd.f32 %v1037_v13, %v836_v19 }
 0x20c   : > { %v861_v22 = vsel %vm857_vm9, %v855_v17, %v859_v20 }
 0x20d   : > { %863 = vst [vmem:[%s309_s24 + $0x8] sm:$0xff] %v861_v22  ;;  %vm856_vm10 = vcmp.ge.f32.partialorder %v854_v21, 0.0  ;;  %v858_v23 = vmul.f32 0.01, %v854_v21 }
 0x20f   : > { %v860_v24 = vsel %vm856_vm10, %v854_v21, %v858_v23 }
 0x210   : > { %862 = vst [vmem:[%s309_s24] sm:$0xff] %v860_v24 }
 0x211 PF: > { %s15_s17 = sadd.s32 1, %s1289_s17   ;;  %s1429_s15 = smov %s1285_s16 }
 0x212   : > { %p12_p4 = scmp.ge.s32.totalorder %s15_s17, 4   ;;  %s1430_s16 = smov %s1432_s18 }
 0x214   :  { %14 = sbr.rel (!%p12_p4) target bundleno = 2 (0x2), region = 78 }
 0x21b   :  { %894 = vsyncpa [#allocation3], 1 }
 0x21c   :  { %896 = vsyncpa [#allocation3 + $0x1], 1 }

</bundles_post_ra>
